<compile_context>
chip_gen: v5e
topology: v5e:2x2
jax: 0.10.0
libtpu: 0.0.40
codegen_flags: <defaults>
</compile_context>

<pallas_src>
import jax
import jax.numpy as jnp
from jax.experimental import pallas as pl
from jax.experimental.pallas import tpu as pltpu

_EPS = 1e-8
_LANE = 128


def _pixelnorm_kernel(x_ref, o_ref):
    # Block: (Bn, C, TL).  Reduce over channels (axis=1, sublane axis); TL -> lanes.
    x = x_ref[...]
    xf = x.astype(jnp.float32)
    ms = jnp.mean(xf * xf, axis=1, keepdims=True)        # (Bn, 1, TL), f32 accum
    inv = jax.lax.rsqrt(ms + _EPS)                        # EUP rsqrt, f32
    # Multiply in f32, cast once at the store (exact for f32; better for bf16).
    o_ref[...] = (xf * inv).astype(o_ref.dtype)


def _cdiv(a, b):
    return -(-a // b)


def _round_up(n, m):
    return _cdiv(n, m) * m


def pixel_norm_1d(x, *, target_block_bytes=3 * 1024 * 1024):
    """PixelNorm1D forward: x / sqrt(mean(x**2, axis=1, keepdims=True) + 1e-8).

    x: (N, C, L) in NCL layout (channel = reduction axis).
    """
    N, C, L = x.shape
    itemsize = jnp.dtype(x.dtype).itemsize

    # Sublane-padded channel count: what a (.., C, ..) VMEM tile really occupies.
    sublane_pack = max(8, 32 // itemsize)          # f32: 8, bf16: 16, int8: 32
    c_pad = _round_up(C, sublane_pack)

    # ---- Lane-axis tile (TL). -----------------------------------------------
    if L < _LANE:
        # Single (ragged) lane block; equals the full array extent, so it
        # satisfies the (8,128) rule without padding.
        tl = L
        l_units = 1
    else:
        l_units = _cdiv(L, _LANE)
        # Byte budget at Bn = 1, plus a >=512 B contiguous-row floor per DMA row.
        lanes_cap = max(1, target_block_bytes // (c_pad * itemsize * _LANE))
        min_units = max(1, _cdiv(512, _LANE * itemsize))   # f32:1  bf16:2  int8:4
        tl_units = max(min_units, min(lanes_cap, l_units))
        tl_units = min(tl_units, l_units)
        tl = tl_units * _LANE

    tl_pad = _round_up(tl, _LANE)                  # lanes the VMEM tile occupies

    # ---- Fold batch rows per block to amortize per-grid-step overhead. -------
    row_bytes = c_pad * tl_pad * itemsize
    bn = max(1, min(N, target_block_bytes // max(1, row_bytes)))

    grid_n = _cdiv(N, bn)
    grid_l = _cdiv(L, tl)

    # v7x has 2 TensorCores sharing HBM bandwidth: keep >=2 parallel grid steps
    # whenever the tensor allows, instead of serializing on one core.
    if grid_n * grid_l < 2:
        if N >= 2:
            bn = _cdiv(N, 2)
            grid_n = _cdiv(N, bn)
        elif L >= 2 * _LANE:
            tl = _round_up(_cdiv(L, 2), _LANE)
            tl_pad = tl
            grid_l = _cdiv(L, tl)

    # ---- VMEM budget: 2 buffers x (input + output), sublane/lane padded. -----
    block_bytes = bn * c_pad * tl_pad * itemsize
    vmem_needed = 4 * block_bytes
    compiler_kwargs = dict(dimension_semantics=("parallel", "parallel"))
    if vmem_needed > 14 * 1024 * 1024:             # above the v5e scoped default
        limit = int(vmem_needed * 5 // 4) + (1 << 20)
        if limit > 48 * 1024 * 1024:               # unsafe vs v7x's 64 MiB physical
            # TODO(synk): add a C-tiling path (extra "arbitrary" grid axis over C
            # with an f32 sum-of-squares scratch accumulator) for very large C.
            raise ValueError(
                f"PixelNorm1D: C={C} needs ~{vmem_needed >> 20} MiB of VMEM "
                "double-buffered; C-tiling is not implemented.")
        compiler_kwargs["vmem_limit_bytes"] = limit

    cost = pl.CostEstimate(
        flops=3 * N * C * L,                       # square, reduce, scale
        transcendentals=N * L,                     # one rsqrt per (n, l)
        bytes_accessed=2 * N * C * L * itemsize,   # 1 read + 1 write
    )

    return pl.pallas_call(
        _pixelnorm_kernel,
        out_shape=jax.ShapeDtypeStruct((N, C, L), x.dtype),
        grid_spec=pltpu.PrefetchScalarGridSpec(
            num_scalar_prefetch=0,
            grid=(grid_n, grid_l),
            in_specs=[pl.BlockSpec((bn, C, tl), lambda i, j: (i, 0, j))],
            out_specs=pl.BlockSpec((bn, C, tl), lambda i, j: (i, 0, j)),
        ),
        compiler_params=pltpu.CompilerParams(**compiler_kwargs),
        cost_estimate=cost,
    )(x)


def _reference(x):
    xf = x.astype(jnp.float32)
    y = xf / jnp.sqrt(jnp.mean(xf * xf, axis=1, keepdims=True) + _EPS)
    return y.astype(x.dtype)


if __name__ == "__main__":
    key = jax.random.PRNGKey(0)

    # Primary small test consistent with a 1D pixel-norm: batch=2, channels=4, seq=16.
    x = jax.random.normal(key, (2, 4, 16), dtype=jnp.float32)
    out = jax.block_until_ready(pixel_norm_1d(x))
    ref = _reference(x)
    assert out.shape == x.shape and out.dtype == x.dtype
    assert jnp.allclose(out, ref, atol=1e-5, rtol=1e-5)

    # Ragged L (not a multiple of 128) + ragged batch block, no pad/slice passes.
    x2 = jax.random.normal(jax.random.PRNGKey(1), (3, 8, 200), dtype=jnp.float32)
    out2 = jax.block_until_ready(pixel_norm_1d(x2))
    ref2 = _reference(x2)
    assert out2.shape == x2.shape and out2.dtype == x2.dtype
    assert jnp.allclose(out2, ref2, atol=1e-5, rtol=1e-5)

    # bf16 with odd channel count (exercises sublane-padded budgeting + f32 math path).
    x3 = jax.random.normal(jax.random.PRNGKey(2), (2, 5, 384), dtype=jnp.bfloat16)
    out3 = jax.block_until_ready(pixel_norm_1d(x3))
    ref3 = _reference(x3)
    assert out3.shape == x3.shape and out3.dtype == x3.dtype
    assert jnp.allclose(out3.astype(jnp.float32), ref3.astype(jnp.float32),
                        atol=2e-2, rtol=2e-2)

    print("KERNEL_OK")
</pallas_src>

<mosaic_0001>
module attributes {stable_mosaic.version = 11 : i64} {
  func.func @_pixelnorm_kernel(%arg0: i32, %arg1: i32, %arg2: memref<1x4x16xf32, #tpu.memory_space<vmem>>, %arg3: memref<1x4x16xf32, #tpu.memory_space<vmem>>) attributes {dimension_semantics = [#tpu.dimension_semantics<parallel>, #tpu.dimension_semantics<parallel>], iteration_bounds = array<i64: 2, 1>, scalar_prefetch = 0 : i64, scratch_operands = 0 : i64, tpu.core_type = #tpu.core_type<tc>, window_params = [{transform_indices = @transform_0, window_bounds = array<i64: 1, 4, 16>}, {transform_indices = @transform_1, window_bounds = array<i64: 1, 4, 16>}]} {
    %c0 = arith.constant 0 : index
    %c0_0 = arith.constant 0 : index
    %c0_1 = arith.constant 0 : index
    %0 = vector.load %arg2[%c0, %c0_0, %c0_1] : memref<1x4x16xf32, #tpu.memory_space<vmem>>, vector<1x4x16xf32>
    %1 = arith.mulf %0, %0 : vector<1x4x16xf32>
    %cst = arith.constant dense<0.000000e+00> : vector<1x16xf32>
    %2 = vector.multi_reduction <add>, %1, %cst [1] : vector<1x4x16xf32> to vector<1x16xf32>
    %3 = vector.shape_cast %2 : vector<1x16xf32> to vector<1x1x16xf32>
    %cst_2 = arith.constant 4.000000e+00 : f32
    %4 = vector.broadcast %cst_2 : f32 to vector<1x1x16xf32>
    %5 = arith.divf %3, %4 : vector<1x1x16xf32>
    %cst_3 = arith.constant 9.99999993E-9 : f32
    %6 = vector.broadcast %cst_3 : f32 to vector<1x1x16xf32>
    %7 = arith.addf %5, %6 : vector<1x1x16xf32>
    %8 = math.rsqrt %7 : vector<1x1x16xf32>
    %9 = vector.broadcast %8 : vector<1x1x16xf32> to vector<1x4x16xf32>
    %10 = arith.mulf %0, %9 : vector<1x4x16xf32>
    %c0_4 = arith.constant 0 : index
    %c0_5 = arith.constant 0 : index
    %c0_6 = arith.constant 0 : index
    %11 = vector.load %arg3[%c0_4, %c0_5, %c0_6] : memref<1x4x16xf32, #tpu.memory_space<vmem>>, vector<1x4x16xf32>
    tpu.vector_store %arg3[%c0_4, %c0_5, %c0_6], %10 {strides = array<i32>} : memref<1x4x16xf32, #tpu.memory_space<vmem>>, vector<1x4x16xf32>,
    return
  }
  func.func @transform_0(%arg0: i32, %arg1: i32) -> (i32, i32, i32) {
    %c0_i32 = arith.constant 0 : i32
    %c0_i32_0 = arith.constant 0 : i32
    return %arg0, %c0_i32, %arg1 : i32, i32, i32
  }
  func.func @transform_1(%arg0: i32, %arg1: i32) -> (i32, i32, i32) {
    %c0_i32 = arith.constant 0 : i32
    %c0_i32_0 = arith.constant 0 : i32
    return %arg0, %c0_i32, %arg1 : i32, i32, i32
  }
}

</mosaic_0001>

<bundles_post_ra>
// kernel: tpu_custom_call.1
= control target key start
LH: loop header
LB: loop body
LE: loop exit
PB: predicated region body
PF: predicated region fallthrough
CT: control target
= control target key end

     0   :  { %6 = vsyncpa [#allocation3], 0  ;;  %s610_s0 = inlined_call_operand.hbm [shape: f32[2,4,16], index: 0, kind: input, shape index: {}]   ;;  %s611_s1 = inlined_call_operand.hbm [shape: f32[2,4,16], index: 1, kind: output, shape index: {}]  }
   0x1   :  { %8 = vsyncpa [#allocation3 + $0x1], 0 }
   0x2   :  { %9 = vsyncpa [#allocation4], 0 }
   0x3   :  { %11 = vsyncpa [#allocation4 + $0x1], 0  ;;  %s484_s6 = smov 0   ;;  %s486_s7 = smov 0  }
   0x4   :  { %s488_s8 = smov 0   ;;  %s490_s9 = smov 0  }
   0x5   :  { %s492_s10 = smov 0   ;;  %s494_s11 = smov 0  }
   0x6 LB: > { %s279_s12 = sadd.s32 4294967295, %s471_s11   ;;  %s280_s13 = sadd.s32 4294967294, %s471_s11   ;;  %s471_s11 = sphi %s494_s11, %s17_s11   ;;  %s467_s10 = sphi %s492_s10, %s620_s10   ;;  %s463_s9 = sphi %s490_s9, %s619_s9   ;;  %s459_s8 = sphi %s488_s8, %s618_s8   ;;  %s455_s7 = sphi %s486_s7, %s617_s7   ;;  %s451_s6 = sphi %s484_s6, %s616_s6  }
   0x7   : > { %s29_s14 = sadd.s32 1, %s467_s10  ;;  %s38_s15 = sadd.s32 1, %s459_s8 }
   0x8   : > { %p31_p0 = scmp.ge.s32.totalorder %s29_s14, 2  ;;  %p45_p1 = scmp.ne.s32.totalorder %s459_s8, %s455_s7 }
   0x9   : > { %p46_p2 = scmp.eq.s32.totalorder %s471_s11, 0  ;;  %p51_p3 = scmp.ne.s32.totalorder %s455_s7, %s451_s6 }
   0xa   : > { %s622_s14 = smov (%p31_p0, %s29_s14), 0  ;;  %p52_p5 = scmp.eq.s32.totalorder %s279_s12, 0 }
   0xb   : > { %p525_p4 = por %p46_p2, %p45_p1  ;;  %s33_s17 = ssub.s32 %s467_s10, %s622_s14 }
   0xc   : > { %p77_p6 = scmp.eq.s32.totalorder %s279_s12, 1  ;;  %p36_p7 = scmp.eq.s32.totalorder %s33_s17, 0 }
   0xd   : > { %p531_p8 = por %p52_p5, %p51_p3  ;;  %p83_p10 = scmp.eq.s32.totalorder %s280_s13, 1 }
   0xe   : > { %p535_p9 = por %p77_p6, %p45_p1  ;;  %p282_p12 = scmp.ge.s32.totalorder %s471_s11, 2 }
   0xf   : > { %s540_s20 = scalar_select %p36_p7, %s459_s8, %s38_s15  }
  0x10   : > { %p542_p11 = por %p83_p10, %p51_p3  ;;  %p304_p13 = scmp.lt.s32.totalorder %s471_s11, 2 }
  0x11   : > { %s103_s22 = sand.u32 1, %s459_s8   ;;  %s284_s24 = sshll.u32 %s467_s10, 2 }
  0x12   : > { %s283_s23 = sshll.u32 %s103_s22, 2  ;;  %s112_s27 = scalar_lea.hbm %s610_s0, %s284_s24 }
  0x13   : > { %s107_s28 = scalar_lea.vmem [#allocation2], %s283_s23  ;;  %s114_s30 = sshll.u32 %s112_s27, 4  ;;  %s115_s30 = int_to_ptr.hbm [resolvable:$true] %s114_s30 }
  0x14   : > { %s116_s29 = sshll.u32 %s107_s28, 4  ;;  %p297_p0 = pnand %p304_p13, %p525_p4  ;;  %s117_s29 = int_to_ptr.vmem [resolvable:$true] %s116_s29 }
  0x15   : > { %p285_p1 = scmp.ge.s32.totalorder %s471_s11, 1  ;;  %p121_p2 = scmp.lt.s32.totalorder %s471_s11, 3 }
  0x16   : > { %s104_s2 = scalar_lea.sflag [#allocation3], %s103_s22 }
  0x17   : > { %299 = dma.hbm_to_vmem [thread:$0]  (!%p297_p0), %s115_s30, 64, %s117_s29, %s104_s2  }
  0x18   : > { %p122_p3 = pnand %p285_p1, %p121_p2 }
  0x19   : > { %s558_s3 = sand.u32 (!%p122_p3), 1, %s455_s7  }
  0x1a   : > { %125 = sbr.rel (%p122_p3) target bundleno = 76 (0x4c), region = 24  ;;  %s286_s4 = sshll.u32 (!%p122_p3), %s558_s3, 2 }
  0x1b   : > { %s128_s5 = scalar_lea.sflag (!%p122_p3), [#allocation3], %s558_s3  ;;  %s131_s12 = scalar_lea.vmem (!%p122_p3), [#allocation2], %s286_s4 }
  0x1f   : > { %442 = dma.done.wait (%p531_p8), %s128_s5, 64  }
  0x20   : > { %444 = vsyncadd (%p531_p8), %s128_s5, 4294967232  ;;  %v473_v0 = vmov 4.0   ;;  %v151_v2 = vld [vmem:[%s131_s12] sm:$0xf]  ;;  %vm153_vm0 = vcmask 125952   ;;  %s289_s13 = sshll.u32 %s463_s9, 2 }
  0x21   : > { %355 = vrcp.f32 %v473_v0  ;;  %v152_v3 = vmul.f32 %v151_v2, %v151_v2  ;;  %s194_s17 = scalar_lea.hbm %s611_s1, %s289_s13  ;;  %s150_s18 = scalar_lea.vmem [#allocation5], %s286_s4 }
  0x22   : > { %s196_s22 = sshll.u32 %s150_s18, 4  ;;  %s198_s23 = sshll.u32 %s194_s17, 4  ;;  %s197_s22 = int_to_ptr.vmem [resolvable:$true] %s196_s22  ;;  %s199_s23 = int_to_ptr.hbm [resolvable:$true] %s198_s23 }
  0x23   : > { %v154_v5 = vsel %vm153_vm0, %v152_v3, 0.0  ;;  %s183_s9 = scalar_lea.sflag [#allocation4], %s558_s3  ;;  %s403_s24 = sshra.s32 %s199_s23, 4  ;;  %s404_s24 = int_to_ptr.hbm [resolvable:$true] %s403_s24 }
  0x24   : > { %v155_v7 = vrot.slane %v154_v5, 4  ;;  %s405_s25 = scalar_lea.hbm %s404_s24, 4  ;;  %s409_s28 = scalar_lea.hbm %s611_s1, 8 }
  0x25   : > { %p406_p4 = scmp.ne.s32.totalorder %s404_s24, %s405_s25  ;;  %p410_p7 = scmp.lt.s32.totalorder %s404_s24, %s611_s1 }
  0x26   : > { %v156_v9 = vadd.f32 %v155_v7, %v154_v5  ;;  %p411_p8 = scmp.lt.s32.totalorder %s409_s28, %s405_s25 }
  0x27   : > { %v356_v1 = vpop.eup %355  ;;  %p407_p5 = pnand %p406_p4, %p535_p9 }
  0x28   : > { %v162_v4 = vmul.f32 4.0, %v356_v1  ;;  %v157_v10 = vrot.slane %v156_v9, 2  ;;  %vm166_vm1 = vweird.f32 %v356_v1  ;;  %p412_p10 = por %p411_p8, %p410_p7 }
  0x29   : > { %p408_p6 = pneg %p407_p5 }
  0x2a   : > { %v163_v6 = vsub.f32 1.0, %v162_v4  ;;  %v158_v12 = vadd.f32 %v157_v10, %v156_v9 }
  0x2b   : > { %p413_p13 = pnand %p412_p10, %p408_p6 }
  0x2c   : > { %v164_v8 = vmul.f32 %v356_v1, %v163_v6  ;;  %v159_v13 = vrot.slane %v158_v12, 1 }
  0x2e   : > { %v165_v11 = vadd.f32 %v356_v1, %v164_v8  ;;  %v160_v15 = vadd.f32 %v159_v13, %v158_v12 }
  0x30   : > { %v167_v14 = vsel %vm166_vm1, %v356_v1, %v165_v11 }
  0x31   : > { %v168_v16 = vmul.f32 %v167_v14, %v160_v15 }
  0x33   : > { %v169_v17 = vadd.f32 1e-08, %v168_v16 }
  0x35   : > { %357 = vrsqrt.f32 %v169_v17  ;;  %vm176_vm2 = vweird.f32 %v169_v17 }
  0x3b   : > { %v358_v18 = vpop.eup %357 }
  0x3c   : > { %v171_v19 = vmul.f32 %v358_v18, %v169_v17  ;;  %vm177_vm3 = vweird.f32 %v358_v18 }
  0x3d   : > { %vm178_vm4 = vmor %vm176_vm2, %vm177_vm3 }
  0x3e   : > { %v172_v20 = vmul.f32 %v358_v18, %v171_v19 }
  0x40   : > { %v173_v21 = vmul.f32 0.5, %v172_v20 }
  0x42   : > { %v174_v22 = vsub.f32 1.5, %v173_v21 }
  0x44   : > { %v175_v23 = vmul.f32 %v358_v18, %v174_v22 }
  0x46   : > { %v179_v24 = vsel %vm178_vm4, %v358_v18, %v175_v23 }
  0x47   : > { %v180_v25 = vmul.f32 %v179_v24, %v151_v2 }
  0x49   : > { %181 = vst.msk [vmem:[%s150_s18] sm:$0xf] %vm153_vm0, %v180_v25 }
  0x4a   : > { %416 = shalt.err (!%p413_p13)
}
  0x4b   : > { %294 = dma.vmem_to_hbm [thread:$0]  (%p535_p9), %s197_s22, 64, %s199_s23, %s183_s9  }
  0x4c PF: > { %s210_s2 = sand.u32 1, %s451_s6   ;;  %p301_p0 = pnand %p282_p12, %p542_p11 }
  0x4d   : > { %s211_s3 = scalar_lea.sflag [#allocation4], %s210_s2 }
  0x4e   : > { %p302_p1 = pneg %p301_p0 }
  0x50   : > { %446 = dma.done.wait (%p302_p1), %s211_s3, 64  }
  0x51   : > { %448 = vsyncadd (%p302_p1), %s211_s3, 4294967232  ;;  %s17_s11 = sadd.s32 1, %s471_s11   ;;  %s616_s6 = smov %s455_s7 }
  0x52   : > { %p14_p2 = scmp.ge.s32.totalorder %s17_s11, 4   ;;  %s617_s7 = smov %s459_s8 }
  0x53   : > { %s618_s8 = smov %s540_s20  ;;  %s619_s9 = smov %s467_s10 }
  0x54   : > { %s620_s10 = smov %s622_s14  ;;  %16 = sbr.rel (!%p14_p2) target bundleno = 6 (0x6), region = 69 }
  0x59   :  { %217 = vsyncpa [#allocation3], 1 }
  0x5a   :  { %219 = vsyncpa [#allocation3 + $0x1], 1 }
  0x5b   :  { %220 = vsyncpa [#allocation4], 1 }
  0x5c   :  { %222 = vsyncpa [#allocation4 + $0x1], 1 }

</bundles_post_ra>
